<compile_context>
chip_gen: v7x
topology: tpu7x:2x2x1
jax: 0.10.0
libtpu: 0.0.40
codegen_flags: <defaults>
</compile_context>

<pallas_src>
import jax
import jax.numpy as jnp
from jax.experimental import pallas as pl
from jax.experimental.pallas import tpu as pltpu


def _linear_relu_kernel(x_ref, w_ref, b_ref, o_ref):
    # K (= Fin = 4) is tiny: unrolled broadcast multiply-adds on (TB, 128)
    # tiles run entirely in the VALU slots and skip the MXU result FIFO.
    x = x_ref[...]                                   # (TB, Fin)
    fin = x.shape[1]
    # Bias added once; never re-broadcast inside the unrolled loop.
    acc = x[:, 0:1] * w_ref[0:1, :] + b_ref[...]     # (TB, Fout)
    for k in range(1, fin):
        acc = acc + x[:, k:k + 1] * w_ref[k:k + 1, :]
    o_ref[...] = jnp.maximum(acc, 0.0).astype(o_ref.dtype)


def _round_up(x, m):
    return (x + m - 1) // m * m


def cnn1_forward(x, w, b, *, max_tb=2048):
    """relu(x @ w + b). x: [B, Fin] f32, w: [Fin, Fout] f32, b: [Fout] f32."""
    B, Fin = x.shape
    Fout = w.shape[1]
    b2d = b.reshape(1, Fout)

    # Batch tile: multiple of 8 (sublane constraint), capped so the
    # double-buffered (TB, Fout) f32 tiles stay small on every chip.
    TB = min(_round_up(B, 8), max_tb)
    B_pad = _round_up(B, TB)
    if B_pad != B:
        x = jnp.pad(x, ((0, B_pad - B), (0, 0)))
    grid = (B_pad // TB,)

    flops = 2 * B_pad * Fin * Fout + 2 * B_pad * Fout          # FMAs + bias + relu
    bytes_accessed = 4 * (B_pad * Fin + Fin * Fout + Fout + B_pad * Fout)

    out = pl.pallas_call(
        _linear_relu_kernel,
        out_shape=jax.ShapeDtypeStruct((B_pad, Fout), x.dtype),
        grid_spec=pltpu.PrefetchScalarGridSpec(
            num_scalar_prefetch=0,
            grid=grid,
            in_specs=[
                pl.BlockSpec((TB, Fin), lambda i: (i, 0)),     # batch-tiled x
                pl.BlockSpec((Fin, Fout), lambda i: (0, 0)),   # resident weight
                pl.BlockSpec((1, Fout), lambda i: (0, 0)),     # resident bias
            ],
            out_specs=pl.BlockSpec((TB, Fout), lambda i: (i, 0)),
        ),
        compiler_params=pltpu.CompilerParams(
            # Batch tiles are independent -> shard across TensorCores on v7x.
            dimension_semantics=("parallel",),
            vmem_limit_bytes=32 * 1024 * 1024,
        ),
        cost_estimate=pl.CostEstimate(
            flops=flops, transcendentals=0, bytes_accessed=bytes_accessed),
    )(x, w, b2d)
    return out[:B] if B_pad != B else out


if __name__ == "__main__":
    key = jax.random.PRNGKey(0)
    kx, kw, kb, kx2 = jax.random.split(key, 4)

    B, Fin, Fout = 2, 4, 128
    # Deterministic params mimicking nn.Linear default init scale
    # (U[-1/sqrt(fan_in), 1/sqrt(fan_in)]).
    bound = 1.0 / jnp.sqrt(jnp.float32(Fin))
    w = jax.random.uniform(kw, (Fin, Fout), jnp.float32, -bound, bound)
    b = jax.random.uniform(kb, (Fout,), jnp.float32, -bound, bound)
    x = jax.random.normal(kx, (B, Fin), jnp.float32)

    out = jax.block_until_ready(cnn1_forward(x, w, b))
    ref = jnp.maximum(x @ w + b, 0.0)
    assert out.shape == (B, Fout)
    assert jnp.allclose(out, ref, atol=1e-5, rtol=1e-5)

    # Sanity-check the padded / multi-row path too (still a small shape).
    x2 = jax.random.normal(kx2, (20, Fin), jnp.float32)
    out2 = jax.block_until_ready(cnn1_forward(x2, w, b))
    ref2 = jnp.maximum(x2 @ w + b, 0.0)
    assert out2.shape == (20, Fout)
    assert jnp.allclose(out2, ref2, atol=1e-5, rtol=1e-5)

    print("KERNEL_OK")
</pallas_src>

<mosaic_0001>
module attributes {stable_mosaic.version = 11 : i64} {
  func.func @_linear_relu_kernel(%arg0: i32, %arg1: memref<8x4xf32, #tpu.memory_space<vmem>>, %arg2: memref<4x128xf32, #tpu.memory_space<vmem>>, %arg3: memref<1x128xf32, #tpu.memory_space<vmem>>, %arg4: memref<8x128xf32, #tpu.memory_space<vmem>>) attributes {dimension_semantics = [#tpu.dimension_semantics<parallel>], iteration_bounds = array<i64: 1>, scalar_prefetch = 0 : i64, scratch_operands = 0 : i64, tpu.core_type = #tpu.core_type<tc>, window_params = [{transform_indices = @transform_0, window_bounds = array<i64: 8, 4>}, {pipeline_mode = #tpu.pipeline_mode<synchronous>, transform_indices = @transform_1, window_bounds = array<i64: 4, 128>}, {pipeline_mode = #tpu.pipeline_mode<synchronous>, transform_indices = @transform_2, window_bounds = array<i64: 1, 128>}, {transform_indices = @transform_3, window_bounds = array<i64: 8, 128>}]} {
    %c0 = arith.constant 0 : index
    %c0_0 = arith.constant 0 : index
    %0 = vector.load %arg1[%c0, %c0_0] : memref<8x4xf32, #tpu.memory_space<vmem>>, vector<8x4xf32>
    %1 = vector.extract_strided_slice %0 {offsets = [0, 0], sizes = [8, 1], strides = [1, 1]} : vector<8x4xf32> to vector<8x1xf32>
    %c0_1 = arith.constant 0 : index
    %c0_2 = arith.constant 0 : index
    %2 = vector.load %arg2[%c0_1, %c0_2] : memref<4x128xf32, #tpu.memory_space<vmem>>, vector<1x128xf32>
    %3 = vector.broadcast %1 : vector<8x1xf32> to vector<8x128xf32>
    %4 = vector.broadcast %2 : vector<1x128xf32> to vector<8x128xf32>
    %5 = arith.mulf %3, %4 : vector<8x128xf32>
    %c0_3 = arith.constant 0 : index
    %c0_4 = arith.constant 0 : index
    %6 = vector.load %arg3[%c0_3, %c0_4] : memref<1x128xf32, #tpu.memory_space<vmem>>, vector<1x128xf32>
    %7 = vector.broadcast %6 : vector<1x128xf32> to vector<8x128xf32>
    %8 = arith.addf %5, %7 : vector<8x128xf32>
    %9 = vector.extract_strided_slice %0 {offsets = [0, 1], sizes = [8, 1], strides = [1, 1]} : vector<8x4xf32> to vector<8x1xf32>
    %c1 = arith.constant 1 : index
    %c0_5 = arith.constant 0 : index
    %10 = vector.load %arg2[%c1, %c0_5] : memref<4x128xf32, #tpu.memory_space<vmem>>, vector<1x128xf32>
    %11 = vector.broadcast %9 : vector<8x1xf32> to vector<8x128xf32>
    %12 = vector.broadcast %10 : vector<1x128xf32> to vector<8x128xf32>
    %13 = arith.mulf %11, %12 : vector<8x128xf32>
    %14 = arith.addf %8, %13 : vector<8x128xf32>
    %15 = vector.extract_strided_slice %0 {offsets = [0, 2], sizes = [8, 1], strides = [1, 1]} : vector<8x4xf32> to vector<8x1xf32>
    %c2 = arith.constant 2 : index
    %c0_6 = arith.constant 0 : index
    %16 = vector.load %arg2[%c2, %c0_6] : memref<4x128xf32, #tpu.memory_space<vmem>>, vector<1x128xf32>
    %17 = vector.broadcast %15 : vector<8x1xf32> to vector<8x128xf32>
    %18 = vector.broadcast %16 : vector<1x128xf32> to vector<8x128xf32>
    %19 = arith.mulf %17, %18 : vector<8x128xf32>
    %20 = arith.addf %14, %19 : vector<8x128xf32>
    %21 = vector.extract_strided_slice %0 {offsets = [0, 3], sizes = [8, 1], strides = [1, 1]} : vector<8x4xf32> to vector<8x1xf32>
    %c3 = arith.constant 3 : index
    %c0_7 = arith.constant 0 : index
    %22 = vector.load %arg2[%c3, %c0_7] : memref<4x128xf32, #tpu.memory_space<vmem>>, vector<1x128xf32>
    %23 = vector.broadcast %21 : vector<8x1xf32> to vector<8x128xf32>
    %24 = vector.broadcast %22 : vector<1x128xf32> to vector<8x128xf32>
    %25 = arith.mulf %23, %24 : vector<8x128xf32>
    %26 = arith.addf %20, %25 : vector<8x128xf32>
    %cst = arith.constant 0.000000e+00 : f32
    %27 = vector.broadcast %cst : f32 to vector<8x128xf32>
    %28 = arith.maximumf %26, %27 : vector<8x128xf32>
    %c0_8 = arith.constant 0 : index
    %c0_9 = arith.constant 0 : index
    %29 = vector.load %arg4[%c0_8, %c0_9] : memref<8x128xf32, #tpu.memory_space<vmem>>, vector<8x128xf32>
    tpu.vector_store %arg4[%c0_8, %c0_9], %28 {strides = array<i32>} : memref<8x128xf32, #tpu.memory_space<vmem>>, vector<8x128xf32>,
    return
  }
  func.func @transform_0(%arg0: i32) -> (i32, i32) {
    %c0_i32 = arith.constant 0 : i32
    %c0_i32_0 = arith.constant 0 : i32
    return %arg0, %c0_i32 : i32, i32
  }
  func.func @transform_1(%arg0: i32) -> (i32, i32) {
    %c0_i32 = arith.constant 0 : i32
    %c0_i32_0 = arith.constant 0 : i32
    %c0_i32_1 = arith.constant 0 : i32
    return %c0_i32, %c0_i32_0 : i32, i32
  }
  func.func @transform_2(%arg0: i32) -> (i32, i32) {
    %c0_i32 = arith.constant 0 : i32
    %c0_i32_0 = arith.constant 0 : i32
    %c0_i32_1 = arith.constant 0 : i32
    return %c0_i32, %c0_i32_0 : i32, i32
  }
  func.func @transform_3(%arg0: i32) -> (i32, i32) {
    %c0_i32 = arith.constant 0 : i32
    %c0_i32_0 = arith.constant 0 : i32
    return %arg0, %c0_i32 : i32, i32
  }
}

</mosaic_0001>

<bundles_post_ra>
// kernel: tpu_custom_call.1
= control target key start
LH: loop header
LB: loop body
LE: loop exit
PB: predicated region body
PF: predicated region fallthrough
CT: control target
= control target key end

     0   :  { %v123_v1 = vmov 0   ;;  %v124_v2 = vmov 2   ;;  %s178_s0 = inlined_call_operand.vmem [shape: f32[8,4], index: 0, kind: input, shape index: {}]   ;;  %s179_s1 = inlined_call_operand.vmem [shape: f32[4,128], index: 1, kind: input, shape index: {}]   ;;  %s180_s2 = inlined_call_operand.vmem [shape: f32[1,128], index: 2, kind: input, shape index: {}]   ;;  %s181_s3 = inlined_call_operand.hbm [shape: f32[8,128], index: 3, kind: output, shape index: {}]  }
   0x1   :  { %v15_v0 = vld [vmem:[%s178_s0] sm:$0xff]  ;;  %94 = vset.pattern.permute.xlu0 %v123_v1  ;;  %96 = vset.pattern.permute.xlu1 %v124_v2 }
   0x2   :  { %8 = vsyncpa [#allocation3], 0  ;;  %19 = vperm.xlu0 %94, %v15_v0   ;;  %48 = vperm.xlu1 %96, %v15_v0   ;;  %v125_v3 = vmov 1   ;;  %v126_v4 = vmov 3   ;;  %v84_v5 = vld [vmem:[%s179_s1] ss:$0 sm:$0xff] }
   0x3   :  { %v85_v9 = vld [vmem:[%s180_s2] ss:$0 sm:$0xff]  ;;  %v86_v10 = vld [vmem:[%s179_s1 + $0x1] ss:$0 sm:$0xff]  ;;  %v87_v11 = vld [vmem:[%s179_s1 + $0x2] ss:$0 sm:$0xff] }
   0x4   :  { %v88_v13 = vld [vmem:[%s179_s1 + $0x3] ss:$0 sm:$0xff]  ;;  %s127_s2 = smov [#allocation2]  }
   0x5   :  { %s76_s23 = sshll.u32 %s127_s2, 4  ;;  %s77_s23 = int_to_ptr.vmem [resolvable:$true] %s76_s23 }
   0x6   :  { %95 = vset.pattern.permute.xlu0 %v125_v3  ;;  %97 = vset.pattern.permute.xlu1 %v126_v4  ;;  %s99_s24 = scalar_lea.vmem %s77_s23, 128  ;;  %p104_p1 = scmp.lt.s32.totalorder %s77_s23, %s77_s23 }
   0x7   :  { %37 = vperm.xlu0 %95, %v15_v0   ;;  %59 = vperm.xlu1 %97, %v15_v0   ;;  %p100_p0 = scmp.ne.s32.totalorder %s77_s23, %s99_s24  ;;  %p105_p2 = scmp.lt.s32.totalorder %s99_s24, %s99_s24 }
   0x9   :  { %p106_p3 = por %p105_p2, %p104_p1 }
   0xb   :  { %98 = vset.pattern.permute.xlu0 %v126_v4  ;;  %p107_p4 = pnand %p106_p3, %p100_p0 }
  0x81   :  { %v20_v6 = vpop.permute.xlu0 %19  ;;  %v49_v7 = vpop.permute.xlu1 %48 }
  0x82   :  { %v26_v8 = vmul.f32 %v84_v5, %v20_v6  ;;  %v55_v17 = vmul.f32 %v87_v11, %v49_v7 }
  0x84   :  { %v34_v15 = vadd.f32 %v85_v9, %v26_v8 }
  0x86   :  { %v38_v12 = vpop.permute.xlu0 %37  ;;  %v60_v14 = vpop.permute.xlu1 %59 }
  0x87   :  { %v44_v16 = vmul.f32 %v86_v10, %v38_v12  ;;  %v66_v19 = vmul.f32 %v88_v13, %v60_v14 }
  0x89   :  { %v45_v18 = vadd.f32 %v44_v16, %v34_v15 }
  0x8b   :  { %v56_v20 = vadd.f32 %v55_v17, %v45_v18 }
  0x8d   :  { %v67_v21 = vadd.f32 %v66_v19, %v56_v20 }
  0x8f   :  { %v68_v22 = vmax.f32 %v67_v21, 0.0 }
  0x91   :  { %69 = vst [vmem:[#allocation2] sm:$0xff] %v68_v22 }
  0x92   :  { %110 = shalt.err (!%p107_p4)
}
  0x93   :  { %s111_s26 = scalar_lea.hbm %s181_s3, 128 }
  0x94   :  { %p112_p5 = scmp.ne.s32.totalorder %s181_s3, %s111_s26  ;;  %p115_p6 = scmp.lt.u32.totalorder %s111_s26, %s181_s3 }
  0x96   :  { %p117_p7 = pnand %p115_p6, %p112_p5 }
  0x98   :  { %120 = shalt.err (!%p117_p7)
}
  0x99   :  { %79 = dma.vmem_to_hbm [thread:$0]  %s77_s23, 128, %s181_s3, [#allocation3]  }
  0x9a   :  { %121 = dma.done.wait [#allocation3], 128  }
  0x9b   :  { %122 = vsyncadd [#allocation3], 4294967168 }
  0x9c   :  { %83 = vsyncpa [#allocation3], 1 }

</bundles_post_ra>
